<compile_context>
chip_gen: v7x
topology: tpu7x:2x2x1
jax: 0.10.0
libtpu: 0.0.40
codegen_flags: <defaults>
</compile_context>

<pallas_src>
import functools

import jax
import jax.numpy as jnp
from jax import lax
from jax.experimental import pallas as pl
from jax.experimental.pallas import tpu as pltpu


def _gelu_exact(x):
    # PyTorch nn.GELU() default is the exact erf formulation.
    return 0.5 * x * (1.0 + lax.erf(x * 0.7071067811865475))


def _se_block_kernel(x_ref, w1_ref, w2_ref, o_ref, *, inv_hw):
    # x_ref: (Bt, C, HW)   w1_ref: (C, Cr)   w2_ref: (Cr, C)   o_ref: (Bt, C, HW)

    # Squeeze: global average pool over the spatial (lane) axis, accumulated in
    # f32.  The block is read here and re-read at the scale step below instead
    # of being held live across the excitation: a multi-MiB block cannot sit in
    # 64 vregs, and keeping it bound would invite a block-sized VMEM spill.
    y = jnp.sum(x_ref[...].astype(jnp.float32), axis=-1) * inv_hw     # (Bt, C)

    # Excitation: Linear -> GELU -> Linear -> Sigmoid.
    w1 = w1_ref[...].astype(jnp.float32)                              # (C, Cr)
    w2 = w2_ref[...].astype(jnp.float32)                              # (Cr, C)
    use_mxu = w1.shape[0] >= 256  # production-sized C -> MXU; tiny C -> VPU/XLU
    if use_mxu:
        h = jnp.dot(y, w1, preferred_element_type=jnp.float32)        # (Bt, Cr)
    else:
        h = jnp.sum(y[:, :, None] * w1[None, :, :], axis=1)           # (Bt, Cr)
    h = _gelu_exact(h)
    if use_mxu:
        s = jnp.dot(h, w2, preferred_element_type=jnp.float32)        # (Bt, C)
    else:
        s = jnp.sum(h[:, :, None] * w2[None, :, :], axis=1)           # (Bt, C)
    # Exact sigmoid: exp goes to the EUP; pl.reciprocal keeps the divide off the
    # VALU as well (approx=False to hold the 1e-5 tolerance vs the reference).
    s = pl.reciprocal(1.0 + jnp.exp(-s), approx=False)

    # Scale: broadcast the per-(batch, channel) gate across all spatial lanes.
    # The gate is cast to the activation dtype before the multiply (memory
    # friendly; for bf16 inputs this is marginally less accurate than f32).
    o_ref[...] = (x_ref[...] * s[:, :, None].astype(o_ref.dtype)).astype(o_ref.dtype)


def _vmem_budget_bytes():
    """Generation-aware VMEM budget (leave ~25% headroom for compiler scratch)."""
    try:
        cap = int(getattr(pltpu.get_tpu_info(), "vmem_capacity_bytes", 0))
    except Exception:
        cap = 0
    if cap <= 0:
        cap = 64 << 20  # conservative floor: v7x per-TensorCore VMEM
    return min((cap * 3) // 4, 100 << 20)


def _pick_batch_tile(batch, per_batch_bytes, resident_w_bytes, vmem_budget):
    """Batches per grid step: VMEM-safe, small enough for >= 8 grid steps."""
    # Residents per pipeline step: 2x input block + 2x output block (double
    # buffered) + double-buffered weights + ~2 MiB slack.
    usable = vmem_budget - resident_w_bytes - (2 << 20)
    fit_cap = max(1, usable // (4 * per_batch_bytes))
    # ~1-2 MiB blocks already sit near the HBM roofline; prefer more grid steps
    # so the BlockSpec pipeline overlaps DMA-in / compute / DMA-out.
    target = max(1, (2 << 20) // per_batch_bytes)
    cap = max(1, min(fit_cap, target))
    # Keep >= 8 total grid steps when the batch allows (>= 4 per v7x TensorCore),
    # otherwise at least 2 so both cores get work.
    if batch >= 8:
        cap = min(cap, max(1, batch // 8))
    elif batch >= 2:
        cap = min(cap, batch // 2)
    bt = 1
    for d in range(1, batch + 1):
        if batch % d == 0 and d <= cap:
            bt = d
    return bt


def se_block(x, w1, w2):
    """x: (B, C, H, W).  w1: (C, C//r).  w2: (C//r, C).  Returns (B, C, H, W)."""
    B, C, H, W = x.shape
    Cr = w1.shape[1]
    HW = H * W

    # Metadata-only reshape: no extra HBM pass, no padding, no output slice.
    x_flat = x.reshape(B, C, HW)

    itemsize = jnp.dtype(x.dtype).itemsize
    per_batch_bytes = C * HW * itemsize
    w_bytes = (C * Cr + Cr * C) * jnp.dtype(w1.dtype).itemsize
    resident_w_bytes = 2 * w_bytes  # double-buffered weight blocks
    vmem_budget = _vmem_budget_bytes()

    Bt = _pick_batch_tile(B, per_batch_bytes, resident_w_bytes, vmem_budget)
    grid = (B // Bt,)

    block_bytes = Bt * per_batch_bytes
    vmem_limit = int(min(vmem_budget,
                         max(4 * block_bytes + 2 * resident_w_bytes + (4 << 20),
                             32 << 20)))
    # TODO(synk): for huge C*HW where even a single-batch block busts the VMEM
    # budget (and for B=1 on v7x, which leaves one TensorCore idle), add a
    # two-phase HW-tiled variant: accumulate channel sums over an 'arbitrary'
    # HW grid axis into scratch, then re-sweep HW applying the gate.

    kernel = functools.partial(_se_block_kernel, inv_hw=1.0 / HW)

    out_flat = pl.pallas_call(
        kernel,
        out_shape=jax.ShapeDtypeStruct((B, C, HW), x.dtype),
        grid_spec=pltpu.PrefetchScalarGridSpec(
            num_scalar_prefetch=0,
            grid=grid,
            in_specs=[
                pl.BlockSpec((Bt, C, HW), lambda b: (b, 0, 0)),
                pl.BlockSpec((C, Cr), lambda b: (0, 0)),
                pl.BlockSpec((Cr, C), lambda b: (0, 0)),
            ],
            out_specs=pl.BlockSpec((Bt, C, HW), lambda b: (b, 0, 0)),
        ),
        compiler_params=pltpu.CompilerParams(
            dimension_semantics=("parallel",),
            vmem_limit_bytes=vmem_limit,
        ),
    )(x_flat, w1, w2)

    return out_flat.reshape(B, C, H, W)


def se_block_ref(x, w1, w2):
    """Pure-JAX reference mirroring the PyTorch forward."""
    y = jnp.mean(x, axis=(2, 3))                  # AdaptiveAvgPool2d(1) + view
    h = _gelu_exact(y @ w1)
    s = jax.nn.sigmoid(h @ w2)
    return x * s[:, :, None, None]


if __name__ == "__main__":
    # Small shapes consistent with the module: in_channels=32, reduction=16.
    B, C, H, W = 2, 32, 16, 16
    reduction_ratio = 16
    Cr = C // reduction_ratio                     # = 2

    key = jax.random.PRNGKey(0)
    kx, k1, k2 = jax.random.split(key, 3)
    x = jax.random.normal(kx, (B, C, H, W), dtype=jnp.float32)
    # nn.Linear(C, C//r) / nn.Linear(C//r, C) weights, stored pre-transposed so
    # the kernel computes y @ w1 / h @ w2 (== y @ W.T in PyTorch).
    w1 = jax.random.normal(k1, (C, Cr), dtype=jnp.float32) * 0.1
    w2 = jax.random.normal(k2, (Cr, C), dtype=jnp.float32) * 0.1

    out = se_block(x, w1, w2)
    out = jax.block_until_ready(out)

    ref = se_block_ref(x, w1, w2)
    assert out.shape == (B, C, H, W)
    assert jnp.allclose(out, ref, atol=1e-5, rtol=1e-5), "mismatch vs reference"

    print("KERNEL_OK")
</pallas_src>

<mosaic_0001>
module attributes {stable_mosaic.version = 11 : i64} {
  func.func @_se_block_kernel(%arg0: i32, %arg1: memref<1x32x256xf32, #tpu.memory_space<vmem>>, %arg2: memref<32x2xf32, #tpu.memory_space<vmem>>, %arg3: memref<2x32xf32, #tpu.memory_space<vmem>>, %arg4: memref<1x32x256xf32, #tpu.memory_space<vmem>>) attributes {dimension_semantics = [#tpu.dimension_semantics<parallel>], iteration_bounds = array<i64: 2>, scalar_prefetch = 0 : i64, scratch_operands = 0 : i64, tpu.core_type = #tpu.core_type<tc>, window_params = [{transform_indices = @transform_0, window_bounds = array<i64: 1, 32, 256>}, {pipeline_mode = #tpu.pipeline_mode<synchronous>, transform_indices = @transform_1, window_bounds = array<i64: 32, 2>}, {pipeline_mode = #tpu.pipeline_mode<synchronous>, transform_indices = @transform_2, window_bounds = array<i64: 2, 32>}, {transform_indices = @transform_3, window_bounds = array<i64: 1, 32, 256>}]} {
    %c0 = arith.constant 0 : index
    %c0_0 = arith.constant 0 : index
    %c0_1 = arith.constant 0 : index
    %0 = vector.load %arg1[%c0, %c0_0, %c0_1] : memref<1x32x256xf32, #tpu.memory_space<vmem>>, vector<1x32x256xf32>
    %cst = arith.constant dense<0.000000e+00> : vector<1x32xf32>
    %1 = vector.multi_reduction <add>, %0, %cst [2] : vector<1x32x256xf32> to vector<1x32xf32>
    %cst_2 = arith.constant 3.906250e-03 : f32
    %2 = vector.broadcast %cst_2 : f32 to vector<1x32xf32>
    %3 = arith.mulf %1, %2 : vector<1x32xf32>
    %c0_3 = arith.constant 0 : index
    %c0_4 = arith.constant 0 : index
    %4 = vector.load %arg2[%c0_3, %c0_4] : memref<32x2xf32, #tpu.memory_space<vmem>>, vector<32x2xf32>
    %c0_5 = arith.constant 0 : index
    %c0_6 = arith.constant 0 : index
    %5 = vector.load %arg3[%c0_5, %c0_6] : memref<2x32xf32, #tpu.memory_space<vmem>>, vector<2x32xf32>
    %6 = vector.shape_cast %3 : vector<1x32xf32> to vector<1x32x1xf32>
    %7 = vector.shape_cast %4 : vector<32x2xf32> to vector<1x32x2xf32>
    %8 = vector.broadcast %6 : vector<1x32x1xf32> to vector<1x32x2xf32>
    %9 = arith.mulf %8, %7 : vector<1x32x2xf32>
    %cst_7 = arith.constant dense<0.000000e+00> : vector<1x2xf32>
    %10 = vector.multi_reduction <add>, %9, %cst_7 [1] : vector<1x32x2xf32> to vector<1x2xf32>
    %cst_8 = arith.constant 5.000000e-01 : f32
    %11 = vector.broadcast %cst_8 : f32 to vector<1x2xf32>
    %12 = arith.mulf %11, %10 : vector<1x2xf32>
    %cst_9 = arith.constant 0.707106769 : f32
    %13 = vector.broadcast %cst_9 : f32 to vector<1x2xf32>
    %14 = arith.mulf %10, %13 : vector<1x2xf32>
    %15 = math.erf %14 : vector<1x2xf32>
    %cst_10 = arith.constant 1.000000e+00 : f32
    %16 = vector.broadcast %cst_10 : f32 to vector<1x2xf32>
    %17 = arith.addf %16, %15 : vector<1x2xf32>
    %18 = arith.mulf %12, %17 : vector<1x2xf32>
    %19 = vector.shape_cast %18 : vector<1x2xf32> to vector<1x2x1xf32>
    %20 = vector.shape_cast %5 : vector<2x32xf32> to vector<1x2x32xf32>
    %21 = vector.broadcast %19 : vector<1x2x1xf32> to vector<1x2x32xf32>
    %22 = arith.mulf %21, %20 : vector<1x2x32xf32>
    %cst_11 = arith.constant dense<0.000000e+00> : vector<1x32xf32>
    %23 = vector.multi_reduction <add>, %22, %cst_11 [1] : vector<1x2x32xf32> to vector<1x32xf32>
    %cst_12 = arith.constant 0.000000e+00 : f32
    %24 = vector.broadcast %cst_12 : f32 to vector<1x32xf32>
    %25 = arith.subf %24, %23 : vector<1x32xf32>
    %26 = math.exp %25 : vector<1x32xf32>
    %cst_13 = arith.constant 1.000000e+00 : f32
    %27 = vector.broadcast %cst_13 : f32 to vector<1x32xf32>
    %28 = arith.addf %27, %26 : vector<1x32xf32>
    %29 = tpu.reciprocal %28 : vector<1x32xf32> -> vector<1x32xf32>
    %c0_14 = arith.constant 0 : index
    %c0_15 = arith.constant 0 : index
    %c0_16 = arith.constant 0 : index
    %30 = vector.load %arg1[%c0_14, %c0_15, %c0_16] : memref<1x32x256xf32, #tpu.memory_space<vmem>>, vector<1x32x256xf32>
    %31 = vector.shape_cast %29 : vector<1x32xf32> to vector<1x32x1xf32>
    %32 = vector.broadcast %31 : vector<1x32x1xf32> to vector<1x32x256xf32>
    %33 = arith.mulf %30, %32 : vector<1x32x256xf32>
    %c0_17 = arith.constant 0 : index
    %c0_18 = arith.constant 0 : index
    %c0_19 = arith.constant 0 : index
    %34 = vector.load %arg4[%c0_17, %c0_18, %c0_19] : memref<1x32x256xf32, #tpu.memory_space<vmem>>, vector<1x32x256xf32>
    tpu.vector_store %arg4[%c0_17, %c0_18, %c0_19], %33 {strides = array<i32>} : memref<1x32x256xf32, #tpu.memory_space<vmem>>, vector<1x32x256xf32>,
    return
  }
  func.func @transform_0(%arg0: i32) -> (i32, i32, i32) {
    %c0_i32 = arith.constant 0 : i32
    %c0_i32_0 = arith.constant 0 : i32
    %c0_i32_1 = arith.constant 0 : i32
    return %arg0, %c0_i32, %c0_i32_0 : i32, i32, i32
  }
  func.func @transform_1(%arg0: i32) -> (i32, i32) {
    %c0_i32 = arith.constant 0 : i32
    %c0_i32_0 = arith.constant 0 : i32
    %c0_i32_1 = arith.constant 0 : i32
    return %c0_i32, %c0_i32_0 : i32, i32
  }
  func.func @transform_2(%arg0: i32) -> (i32, i32) {
    %c0_i32 = arith.constant 0 : i32
    %c0_i32_0 = arith.constant 0 : i32
    %c0_i32_1 = arith.constant 0 : i32
    return %c0_i32, %c0_i32_0 : i32, i32
  }
  func.func @transform_3(%arg0: i32) -> (i32, i32, i32) {
    %c0_i32 = arith.constant 0 : i32
    %c0_i32_0 = arith.constant 0 : i32
    %c0_i32_1 = arith.constant 0 : i32
    return %arg0, %c0_i32, %c0_i32_0 : i32, i32, i32
  }
}

</mosaic_0001>

<bundles_post_ra>
// kernel: tpu_custom_call.1
= control target key start
LH: loop header
LB: loop body
LE: loop exit
PB: predicated region body
PF: predicated region fallthrough
CT: control target
= control target key end

     0   :  { %8 = vsyncpa [#allocation3], 0  ;;  %s785_s0 = inlined_call_operand.hbm [shape: f32[2,32,256], index: 0, kind: input, shape index: {}]   ;;  %s786_s1 = inlined_call_operand.vmem [shape: f32[32,2], index: 1, kind: input, shape index: {}]   ;;  %s787_s2 = inlined_call_operand.vmem [shape: f32[2,32], index: 2, kind: input, shape index: {}]   ;;  %s788_s3 = inlined_call_operand.hbm [shape: f32[2,32,256], index: 3, kind: output, shape index: {}]  }
   0x1   :  { %10 = vsyncpa [#allocation3 + $0x1], 0 }
   0x2   :  { %11 = vsyncpa [#allocation4], 0 }
   0x3   :  { %13 = vsyncpa [#allocation4 + $0x1], 0  ;;  %s572_s12 = smov 0   ;;  %s574_s13 = smov 0  }
   0x4   :  { %s576_s14 = smov 0   ;;  %s578_s15 = smov 0  }
   0x5 LB: > { %s593_s16 = sadd.s32 4294967295, %s544_s15   ;;  %s376_s17 = sadd.s32 4294967294, %s544_s15   ;;  %s544_s15 = sphi %s578_s15, %s801_s15   ;;  %s540_s14 = sphi %s576_s14, %s800_s14   ;;  %s536_s13 = sphi %s574_s13, %s799_s13   ;;  %s532_s12 = sphi %s572_s12, %s798_s12  }
   0x6   : > { %s597_s18 = sadd.s32 1, %s544_s15   ;;  %s26_s19 = sadd.s32 1, %s540_s14 }
   0x7   : > { %s23_s20 = ssub.s32 %s544_s15, %s597_s18  ;;  %p33_p0 = scmp.ne.s32.totalorder %s540_s14, %s536_s13 }
   0x8   : > { %p24_p1 = scmp.eq.s32.totalorder %s23_s20, 0  ;;  %p34_p2 = scmp.eq.s32.totalorder %s544_s15, 0 }
   0x9   : > { %p39_p3 = scmp.ne.s32.totalorder %s536_s13, %s532_s12  ;;  %p40_p4 = scmp.eq.s32.totalorder %s593_s16, 0 }
   0xa   : > { %s609_s21 = scalar_select %p24_p1, %s540_s14, %s26_s19  }
   0xb   : > { %p611_p5 = por %p34_p2, %p33_p0  ;;  %p615_p6 = por %p40_p4, %p39_p3 }
   0xc   : > { %p105_p7 = scmp.eq.s32.totalorder %s593_s16, 1  ;;  %p111_p8 = scmp.eq.s32.totalorder %s376_s17, 1 }
   0xd   : > { %p404_p10 = scmp.lt.s32.totalorder %s544_s15, 2  ;;  %s137_s26 = sand.u32 1, %s540_s14  }
   0xe   : > { %p622_p11 = por %p105_p7, %p33_p0  ;;  %p626_p12 = por %p111_p8, %p39_p3 }
   0xf   : > { %s390_s27 = sshll.u32 %s544_s15, 10  ;;  %s379_s28 = sshll.u32 %s137_s26, 6 }
  0x10   : > { %s792_s24 = scalar_select %p622_p11, 1, 0 }
  0x11   : > { %s793_s25 = scalar_select %p626_p12, 1, 0 }
  0x12   : > { %s635_s4 = scalar_lea.hbm %s785_s0, %s390_s27  ;;  %s141_s5 = scalar_lea.vmem [#allocation2], %s379_s28 }
  0x13   : > { %s148_s6 = sshll.u32 %s141_s5, 4  ;;  %p639_p13 = pnand %p404_p10, %p611_p5  ;;  %s643_s6 = int_to_ptr.vmem [resolvable:$true] %s148_s6 }
  0x14   : > { %s645_s8 = scalar_lea.sflag [#allocation3], %s137_s26  ;;  %s448_s9 = scalar_lea.hbm %s635_s4, 1024 }
  0x15   : > { %p449_p0 = scmp.ne.s32.totalorder %s635_s4, %s448_s9  ;;  %p450_p1 = pneg %p639_p13 }
  0x16   : > { %s453_s17 = scalar_lea.hbm %s785_s0, 2048  ;;  %p454_p4 = scmp.lt.u32.totalorder %s635_s4, %s785_s0 }
  0x17   : > { %p451_p2 = pnand %p450_p1, %p449_p0  ;;  %p455_p5 = scmp.lt.u32.totalorder %s453_s17, %s448_s9 }
  0x18   : > { %p457_p8 = scmp.lt.u32.totalorder %s448_s9, %s635_s4 }
  0x19   : > { %p452_p3 = pneg %p451_p2  ;;  %p456_p7 = por %p455_p5, %p454_p4 }
  0x1b   : > { %p458_p10 = por %p457_p8, %p456_p7 }
  0x1d   : > { %p459_p9 = pnand %p458_p10, %p452_p3 }
  0x1f   : > { %462 = shalt.err (!%p459_p9)
}
  0x20   : > { %s463_s22 = scalar_lea.vmem %s643_s6, 1024  ;;  %s546_s26 = smov [#allocation2]  }
  0x21   : > { %p464_p0 = scmp.ne.s32.totalorder %s643_s6, %s463_s22  ;;  %s468_s27 = sshll.u32 %s546_s26, 4  ;;  %s469_s27 = int_to_ptr.vmem [resolvable:$false] %s468_s27 }
  0x22   : > { %s470_s28 = scalar_lea.vmem %s469_s27, 2048  ;;  %p471_p11 = scmp.lt.s32.totalorder %s643_s6, %s469_s27 }
  0x23   : > { %p466_p2 = pnand %p464_p0, %p450_p1  ;;  %p472_p4 = scmp.lt.s32.totalorder %s470_s28, %s463_s22 }
  0x25   : > { %p467_p12 = pneg %p466_p2  ;;  %p473_p5 = por %p472_p4, %p471_p11 }
  0x27   : > { %p474_p7 = pnand %p473_p5, %p467_p12 }
  0x29   : > { %477 = shalt.err (!%p474_p7)
}
  0x2a   : > { %s547_s29 = smov 256   ;;  %s548_s30 = smov 16  }
  0x2b   : > { %399 = dma.hbm_to_vmem [thread:$0]  (!%p639_p13), %s635_s4, 1024, %s643_s6, %s645_s8, %s547_s29, %s547_s29, %s548_s30  }
  0x2c   : > { %p382_p9 = scmp.ge.s32.totalorder %s544_s15, 1  ;;  %p156_p1 = scmp.lt.s32.totalorder %s544_s15, 3 }
  0x2e   : > { %p157_p3 = pnand %p382_p9, %p156_p1 }
  0x2f   : > { %s676_s5 = sand.u32 (!%p157_p3), 1, %s536_s13  }
  0x30   : > { %160 = sbr.rel (%p157_p3) target bundleno = 543 (0x21f), region = 32  ;;  %s383_s9 = sshll.u32 (!%p157_p3), %s676_s5, 6 }
  0x31   : > { %s163_s10 = scalar_lea.sflag (!%p157_p3), [#allocation3], %s676_s5  ;;  %s166_s11 = scalar_lea.vmem (!%p157_p3), [#allocation2], %s383_s9 }
  0x37   : > { %523 = dma.done.wait (%p615_p6), %s163_s10, 1024  }
  0x38   : > { %525 = vsyncadd (%p615_p6), %s163_s10, 4294966272  ;;  %v686_v0 = vld [vmem:[%s166_s11] sm:$0xff]  ;;  %v688_v1 = vld [vmem:[%s166_s11 + $0x8] sm:$0xff]  ;;  %vm222_vm0 = vcmask 15360   ;;  %vm245_vm1 = vcmask 254976   ;;  %s188_s27 = scalar_lea.vmem [#allocation5], %s383_s9 }
  0x39   : > { %v690_v2 = vld [vmem:[%s166_s11 + $0x20] sm:$0xff]  ;;  %v197_v3 = vadd.f32 %v688_v1, %v686_v0  ;;  %v694_v4 = vld [vmem:[%s166_s11 + $0x28] sm:$0xff]  ;;  %v696_v5 = vld [vmem:[%s166_s11 + $0x10] sm:$0xff]  ;;  %s303_s28 = sshll.u32 %s188_s27, 4  ;;  %s391_s29 = sshll.u32 %s593_s16, 10  ;;  %s734_s28 = int_to_ptr.vmem [resolvable:$true] %s303_s28 }
  0x3a   : > { %v698_v6 = vld [vmem:[%s166_s11 + $0x18] sm:$0xff]  ;;  %v203_v7 = vadd.f32 %v694_v4, %v690_v2  ;;  %v702_v8 = vld [vmem:[%s166_s11 + $0x30] sm:$0xff]  ;;  %v213_v15 = vld [vmem:[%s786_s1] sm:$0xff]  ;;  %s739_s10 = scalar_lea.hbm %s788_s3, %s391_s29  ;;  %s290_s16 = scalar_lea.sflag [#allocation4], %s676_s5 }
  0x3b   : > { %v704_v9 = vld [vmem:[%s166_s11 + $0x38] sm:$0xff]  ;;  %198 = vadd.xlane.f32.xlu0 %v197_v3  ;;  %v200_v10 = vadd.f32 %v698_v6, %v696_v5  ;;  %v215_v17 = vld [vmem:[%s786_s1 + $0x10] sm:$0xff]  ;;  %v214_v18 = vld [vmem:[%s786_s1 + $0x8] sm:$0xff]  ;;  %s478_s11 = scalar_lea.vmem %s734_s28, 1024  ;;  %p795_p11 = scmp.ne.s32.totalorder %s792_s24, 0 }
  0x3c   : > { %204 = vadd.xlane.f32.xlu1 %v203_v7  ;;  %v206_v11 = vadd.f32 %v704_v9, %v702_v8  ;;  %v216_v22 = vld [vmem:[%s786_s1 + $0x18] sm:$0xff]  ;;  %v217_v46 = vld [vmem:[%s787_s2] sm:$0x3]  ;;  %p479_p6 = scmp.ne.s32.totalorder %s734_s28, %s478_s11  ;;  %s549_s23 = smov [#allocation5]  }
  0x3d   : > { %s482_s4 = sshll.u32 %s549_s23, 4  ;;  %s483_s4 = int_to_ptr.vmem [resolvable:$false] %s482_s4 }
  0x3e   : > { %p480_p12 = pnand %p479_p6, %p795_p11  ;;  %s484_s6 = scalar_lea.vmem %s483_s4, 2048 }
  0x3f   : > { %201 = vadd.xlane.f32.xlu0 %v200_v10  ;;  %p485_p8 = scmp.lt.s32.totalorder %s734_s28, %s483_s4  ;;  %p486_p10 = scmp.lt.s32.totalorder %s484_s6, %s478_s11 }
  0x40   : > { %207 = vadd.xlane.f32.xlu1 %v206_v11  ;;  %p481_p13 = pneg %p480_p12 }
  0x41   : > { %p487_p0 = por %p486_p10, %p485_p8 }
  0x43   : > { %p488_p2 = pnand %p487_p0, %p481_p13 }
  0xc8   : > { %v199_v12 = vpop.xlane.xlu0 %198 }
  0xc9   : > { %v209_v13 = vmul.f32 0.00390625, %v199_v12  ;;  %v205_v14 = vpop.xlane.xlu1 %204 }
  0xca   : > { %v211_v16 = vmul.f32 0.00390625, %v205_v14 }
  0xcb   : > { %v218_v20 = vmul.f32 %v213_v15, %v209_v13 }
  0xcc   : > { %v202_v19 = vpop.xlane.xlu0 %201  ;;  %v220_v25 = vmul.f32 %v215_v17, %v211_v16 }
  0xcd   : > { %v210_v21 = vmul.f32 0.00390625, %v202_v19  ;;  %v208_v23 = vpop.xlane.xlu1 %207  ;;  %v223_v28 = vsel %vm222_vm0, %v218_v20, 0.0 }
  0xce   : > { %v212_v24 = vmul.f32 0.00390625, %v208_v23  ;;  %v226_v31 = vsel %vm222_vm0, %v220_v25, 0.0 }
  0xcf   : > { %v219_v26 = vmul.f32 %v214_v18, %v210_v21 }
  0xd0   : > { %v221_v27 = vmul.f32 %v216_v22, %v212_v24 }
  0xd1   : > { %v224_v29 = vsel %vm222_vm0, %v219_v26, 0.0 }
  0xd2   : > { %v225_v30 = vadd.f32 %v224_v29, %v223_v28  ;;  %v228_v32 = vsel %vm222_vm0, %v221_v27, 0.0 }
  0xd4   : > { %v227_v33 = vadd.f32 %v226_v31, %v225_v30 }
  0xd6   : > { %v229_v34 = vadd.f32 %v228_v32, %v227_v33 }
  0xd8   : > { %v230_v35 = vrot.slane %v229_v34, 4 }
  0xda   : > { %v231_v36 = vadd.f32 %v230_v35, %v229_v34 }
  0xdc   : > { %v232_v37 = vrot.slane %v231_v36, 2 }
  0xde   : > { %v233_v38 = vadd.f32 %v232_v37, %v231_v36 }
  0xe0   : > { %v234_v39 = vrot.slane %v233_v38, 1 }
  0xe2   : > { %v235_v40 = vadd.f32 %v234_v39, %v233_v38 }
  0xe4   : > { %v237_v41 = vmul.f32 0.70710677, %v235_v40  ;;  %v236_v43 = vmul.f32 0.5, %v235_v40 }
  0xe6   : > { %442 = verf.f32 %v237_v41 }
  0xf0   : > { %v443_v42 = vpop.eup %442 }
  0xf1   : > { %v239_v44 = vadd.f32 1.0, %v443_v42 }
  0xf3   : > { %v240_v45 = vmul.f32 %v239_v44, %v236_v43 }
  0xf5   : > { %242 = vbcast.lane.b32.xlu0 %v240_v45, 256 }
 0x167   : > { %v243_v47 = vpop.permute.xlu0 %242 }
 0x168   : > { %v244_v48 = vmul.f32 %v243_v47, %v217_v46 }
 0x16a   : > { %v246_v49 = vsel %vm245_vm1, %v244_v48, 0.0 }
 0x16b   : > { %v247_v50 = vrot.slane %v246_v49, 4 }
 0x16d   : > { %v248_v51 = vadd.f32 %v247_v50, %v246_v49 }
 0x16f   : > { %v249_v52 = vrot.slane %v248_v51, 2 }
 0x171   : > { %v250_v53 = vadd.f32 %v249_v52, %v248_v51 }
 0x173   : > { %v251_v54 = vrot.slane %v250_v53, 1 }
 0x175   : > { %v252_v55 = vadd.f32 %v251_v54, %v250_v53 }
 0x177   : > { %v253_v56 = vsub.f32 0.0, %v252_v55 }
 0x179   : > { %v254_v57 = vmul.f32 1.442695, %v253_v56 }
 0x17b   : > { %444 = vpow2.f32 %v254_v57 }
 0x185   : > { %v445_v58 = vpop.eup %444 }
 0x186   : > { %v256_v59 = vadd.f32 1.0, %v445_v58 }
 0x188   : > { %446 = vrcp.f32 %v256_v59 }
 0x192   : > { %v447_v60 = vpop.eup %446 }
 0x193   : > { %271 = vbcast.lane.b32.xlu0 %v447_v60, 280  ;;  %259 = vbcast.lane.b32.xlu1 %v447_v60, 256 }
 0x197   : > { %263 = vbcast.lane.b32.xlu1 %v447_v60, 264 }
 0x19b   : > { %267 = vbcast.lane.b32.xlu1 %v447_v60, 272 }
 0x205   : > { %v272_v61 = vpop.permute.xlu0 %271  ;;  %v260_v62 = vpop.permute.xlu1 %259 }
 0x206   : > { %v279_v63 = vmul.f32 %v272_v61, %v702_v8  ;;  %v280_v3 = vmul.f32 %v272_v61, %v704_v9  ;;  %v273_v7 = vmul.f32 %v260_v62, %v686_v0  ;;  %v274_v10 = vmul.f32 %v260_v62, %v688_v1 }
 0x208   : > { %287 = vst [vmem:[%s188_s27 + $0x30] sm:$0xff] %v279_v63  ;;  %288 = vst [vmem:[%s188_s27 + $0x38] sm:$0xff] %v280_v3 }
 0x209   : > { %281 = vst [vmem:[%s188_s27] sm:$0xff] %v273_v7  ;;  %282 = vst [vmem:[%s188_s27 + $0x8] sm:$0xff] %v274_v10  ;;  %v264_v11 = vpop.permute.xlu1 %263 }
 0x20a   : > { %v275_v12 = vmul.f32 %v264_v11, %v696_v5  ;;  %v276_v8 = vmul.f32 %v264_v11, %v698_v6 }
 0x20c   : > { %283 = vst [vmem:[%s188_s27 + $0x10] sm:$0xff] %v275_v12  ;;  %284 = vst [vmem:[%s188_s27 + $0x18] sm:$0xff] %v276_v8 }
 0x20d   : > { %v268_v0 = vpop.permute.xlu1 %267 }
 0x20e   : > { %v277_v1 = vmul.f32 %v268_v0, %v690_v2  ;;  %v278_v5 = vmul.f32 %v268_v0, %v694_v4 }
 0x210   : > { %285 = vst [vmem:[%s188_s27 + $0x20] sm:$0xff] %v277_v1  ;;  %286 = vst [vmem:[%s188_s27 + $0x28] sm:$0xff] %v278_v5 }
 0x211   : > { %491 = shalt.err (!%p488_p2)
}
 0x212   : > { %s492_s7 = scalar_lea.hbm %s739_s10, 1024  ;;  %s496_s19 = scalar_lea.hbm %s788_s3, 2048 }
 0x213   : > { %p493_p4 = scmp.ne.s32.totalorder %s739_s10, %s492_s7  ;;  %p497_p9 = scmp.lt.u32.totalorder %s739_s10, %s788_s3 }
 0x214   : > { %p498_p1 = scmp.lt.u32.totalorder %s496_s19, %s492_s7  ;;  %p500_p6 = scmp.lt.u32.totalorder %s492_s7, %s739_s10 }
 0x215   : > { %p494_p5 = pnand %p493_p4, %p795_p11 }
 0x216   : > { %p499_p3 = por %p498_p1, %p497_p9 }
 0x217   : > { %p495_p7 = pneg %p494_p5 }
 0x218   : > { %p501_p12 = por %p500_p6, %p499_p3 }
 0x21a   : > { %p502_p13 = pnand %p501_p12, %p495_p7 }
 0x21c   : > { %505 = shalt.err (!%p502_p13)
}
 0x21d   : > { %s550_s26 = smov 256   ;;  %s551_s27 = smov 16  }
 0x21e   : > { %394 = dma.vmem_to_hbm [thread:$0]  (%p795_p11), %s734_s28, 1024, %s739_s10, %s290_s16, %s550_s26, %s550_s26, %s551_s27  }
 0x21f PF: > { %s318_s29 = sand.u32 1, %s532_s12   ;;  %p796_p8 = scmp.ne.s32.totalorder %s793_s25, 0 }
 0x220   : > { %p797_p10 = scmp.ge.s32.totalorder %s544_s15, 2  ;;  %s319_s30 = scalar_lea.sflag [#allocation4], %s318_s29 }
 0x222   : > { %p401_p0 = pnand %p797_p10, %p796_p8 }
 0x224   : > { %527 = dma.done.wait (!%p401_p0), %s319_s30, 1024  }
 0x225   : > { %529 = vsyncadd (!%p401_p0), %s319_s30, 4294966272  ;;  %p16_p2 = scmp.ge.s32.totalorder %s597_s18, 4   ;;  %s798_s12 = smov %s536_s13 }
 0x226   : > { %s799_s13 = smov %s540_s14  ;;  %s800_s14 = smov %s609_s21 }
 0x227   : > { %s801_s15 = smov %s597_s18  ;;  %18 = sbr.rel (!%p16_p2) target bundleno = 5 (0x5), region = 77 }
 0x22e   :  { %324 = vsyncpa [#allocation3], 1 }
 0x22f   :  { %326 = vsyncpa [#allocation3 + $0x1], 1 }
 0x230   :  { %327 = vsyncpa [#allocation4], 1 }
 0x231   :  { %329 = vsyncpa [#allocation4 + $0x1], 1 }

</bundles_post_ra>
